<compile_context>
chip_gen: v7x
topology: tpu7x:2x2x1
jax: 0.10.0
libtpu: 0.0.40
codegen_flags: <defaults>
</compile_context>

<pallas_src>
import jax
import jax.numpy as jnp
from jax import lax
from jax.experimental import pallas as pl
from jax.experimental.pallas import tpu as pltpu


def _gaussian_kernel_body(neg2scale_ref, xi_ref, xj_ref, a_ref, b_ref, o_ref):
    """One (tm, tn) output tile: exp(min(a_i + b_j + (-2*scale) * <x_i, x_j>, 0))."""
    # MXU contraction Xi @ Xj^T without transposing the column tile
    # (contract axis 1 of both operands), f32 accumulation.
    g = lax.dot_general(
        xi_ref[...], xj_ref[...],
        dimension_numbers=(((1,), (1,)), ((), ())),
        preferred_element_type=jnp.float32,
    )                                              # (tm, tn)

    a = a_ref[...]                                 # (tm, 1)  = scale * ||x_i||^2
    b = b_ref[...]                                 # (1, tn)  = scale * ||x_j||^2
    t = a + b + neg2scale_ref[0, 0] * g            # = scale * d2  (<= 0 exactly)

    # scale < 0 and d2 >= 0  =>  t <= 0; min() clamps cancellation noise from
    # the MXU identity (replaces the old max(d2, 0) followed by a mul).
    o_ref[...] = jnp.exp(jnp.minimum(t, 0.0)).astype(o_ref.dtype)


def _pick_tiles(n: int, f: int, itemsize: int, vmem_budget: int):
    """Tile sizes: single block for small N, fixed 512/256 x 256 tiles otherwise."""
    if n <= 256:
        return n, n                                # tiny; one block, no masking needed
    tn = 256
    tm = 256
    for cand in (512, 256):
        if cand > n:
            continue
        in_bytes = 2 * (cand + tn) * f * itemsize  # double-buffered X row/col tiles
        out_bytes = 2 * cand * tn * itemsize       # double-buffered output tile
        tmp_bytes = 3 * cand * tn * 4              # f32 g / t temporaries headroom
        if in_bytes + out_bytes + tmp_bytes <= vmem_budget:
            tm = cand
            break
    return tm, tn


def gaussian_kernel(X, sigma=None, track_running_stats=True, alpha=1.0,
                    vmem_limit_bytes=48 * 1024 * 1024):
    """Pallas implementation of GaussianKernel.forward.

    X: (N, F) array. Returns (N, N) kernel matrix K[i, j] = k(x_i, x_j).
    """
    assert track_running_stats or sigma is not None
    N, F = X.shape

    # O(N*F) pre-pass in plain JAX (off the critical path of the O(N^2*F) kernel):
    # squared row norms, reused both for sigma^2 and as kernel inputs.
    xf = X.astype(jnp.float32)
    r = jnp.sum(xf * xf, axis=-1)                  # (N,)  ||x_i||^2

    if track_running_stats:
        # sigma^2 = alpha * mean_{i,j} ||x_i - x_j||^2
        #         = alpha * (2*mean_i ||x_i||^2 - 2*||mean_i x_i||^2)
        mu = jnp.mean(xf, axis=0)
        mean_d2 = 2.0 * jnp.mean(r) - 2.0 * jnp.sum(mu * mu)
        sigma_square = jnp.float32(alpha) * mean_d2
    else:
        sigma_square = jnp.float32(float(sigma) * float(sigma))

    # TODO(synk): if all rows of X are identical, sigma_square == 0 and the
    # diagonal is NaN — this matches the PyTorch reference's division by zero.
    scale = (-0.5 / sigma_square).astype(jnp.float32)          # < 0
    a = (scale * r).astype(jnp.float32).reshape(N, 1)          # pre-scaled row norms
    b = (scale * r).astype(jnp.float32).reshape(1, N)          # pre-scaled col norms
    neg2scale = (-2.0 * scale).reshape(1, 1).astype(jnp.float32)

    tm, tn = _pick_tiles(N, F, X.dtype.itemsize, vmem_limit_bytes)
    grid = (pl.cdiv(N, tm), pl.cdiv(N, tn))        # partial edge tiles are masked

    return pl.pallas_call(
        _gaussian_kernel_body,
        out_shape=jax.ShapeDtypeStruct((N, N), X.dtype),
        grid=grid,
        in_specs=[
            # Precomputed scalar -2*scale in SMEM (shared by every tile).
            pl.BlockSpec(memory_space=pltpu.MemorySpace.SMEM),
            # Row tile of X: depends only on grid axis i.
            pl.BlockSpec((tm, F), lambda i, j: (i, 0)),
            # Column tile of X: depends only on grid axis j (no transpose needed).
            pl.BlockSpec((tn, F), lambda i, j: (j, 0)),
            # Pre-scaled row / column squared norms.
            pl.BlockSpec((tm, 1), lambda i, j: (i, 0)),
            pl.BlockSpec((1, tn), lambda i, j: (0, j)),
        ],
        out_specs=pl.BlockSpec((tm, tn), lambda i, j: (i, j)),
        compiler_params=pltpu.CompilerParams(
            dimension_semantics=("parallel", "parallel"),
            vmem_limit_bytes=vmem_limit_bytes,
        ),
    )(neg2scale, X, X, a, b)


def _reference(X, sigma=None, track_running_stats=True, alpha=1.0):
    # Pure-JAX reference mirroring the PyTorch forward exactly (broadcast diff).
    d2 = jnp.sum((X[None, :, :] - X[:, None, :]) ** 2, axis=2)
    if track_running_stats:
        sigma_square = alpha * jnp.mean(d2)
    else:
        sigma_square = jnp.float32(float(sigma) * float(sigma))
    return jnp.exp(-d2 / (2.0 * sigma_square))


if __name__ == "__main__":
    key = jax.random.PRNGKey(0)

    # Primary small case matching the module's (minibatch, F) convention.
    N, F = 8, 32
    X = jax.random.normal(key, (N, F), dtype=jnp.float32)

    # track_running_stats=True path (sigma^2 estimated from mean L2 distance).
    K = gaussian_kernel(X, sigma=None, track_running_stats=True, alpha=1.0)
    jax.block_until_ready(K)
    K_ref = _reference(X, sigma=None, track_running_stats=True, alpha=1.0)
    assert K.shape == (N, N)
    assert jnp.allclose(K, K_ref, atol=1e-4, rtol=1e-4)

    # Fixed-sigma path (track_running_stats=False).
    K_fixed = gaussian_kernel(X, sigma=1.5, track_running_stats=False)
    jax.block_until_ready(K_fixed)
    K_fixed_ref = _reference(X, sigma=1.5, track_running_stats=False)
    assert jnp.allclose(K_fixed, K_fixed_ref, atol=1e-4, rtol=1e-4)

    # Multi-tile grid path (exercises the (512, 256) tiling and 2-D grid).
    N2, F2 = 512, 64
    X2 = jax.random.normal(jax.random.PRNGKey(1), (N2, F2), dtype=jnp.float32)
    K2 = gaussian_kernel(X2, sigma=None, track_running_stats=True, alpha=1.0)
    jax.block_until_ready(K2)
    K2_ref = _reference(X2, sigma=None, track_running_stats=True, alpha=1.0)
    assert jnp.allclose(K2, K2_ref, atol=1e-4, rtol=1e-4)

    # Awkward N (not tile-aligned): exercises masked partial edge tiles.
    N3, F3 = 320, 48
    X3 = jax.random.normal(jax.random.PRNGKey(2), (N3, F3), dtype=jnp.float32)
    K3 = gaussian_kernel(X3, sigma=None, track_running_stats=True, alpha=1.0)
    jax.block_until_ready(K3)
    K3_ref = _reference(X3, sigma=None, track_running_stats=True, alpha=1.0)
    assert jnp.allclose(K3, K3_ref, atol=1e-4, rtol=1e-4)

    print("KERNEL_OK")
</pallas_src>

<mosaic_0001>
module attributes {stable_mosaic.version = 11 : i64} {
  func.func @_gaussian_kernel_body(%arg0: i32, %arg1: i32, %arg2: memref<1x1xf32, #tpu.memory_space<smem>>, %arg3: memref<8x32xf32, #tpu.memory_space<vmem>>, %arg4: memref<8x32xf32, #tpu.memory_space<vmem>>, %arg5: memref<8x1xf32, #tpu.memory_space<vmem>>, %arg6: memref<1x8xf32, #tpu.memory_space<vmem>>, %arg7: memref<8x8xf32, #tpu.memory_space<vmem>>) attributes {dimension_semantics = [#tpu.dimension_semantics<parallel>, #tpu.dimension_semantics<parallel>], iteration_bounds = array<i64: 1, 1>, scalar_prefetch = 0 : i64, scratch_operands = 0 : i64, tpu.core_type = #tpu.core_type<tc>, window_params = [{transform_indices = @transform_0, window_bounds = array<i64: 1, 1>}, {transform_indices = @transform_1, window_bounds = array<i64: 8, 32>}, {transform_indices = @transform_2, window_bounds = array<i64: 8, 32>}, {transform_indices = @transform_3, window_bounds = array<i64: 8, 1>}, {transform_indices = @transform_4, window_bounds = array<i64: 1, 8>}, {transform_indices = @transform_5, window_bounds = array<i64: 8, 8>}]} {
    %c0 = arith.constant 0 : index
    %c0_0 = arith.constant 0 : index
    %0 = vector.load %arg3[%c0, %c0_0] : memref<8x32xf32, #tpu.memory_space<vmem>>, vector<8x32xf32>
    %c0_1 = arith.constant 0 : index
    %c0_2 = arith.constant 0 : index
    %1 = vector.load %arg4[%c0_1, %c0_2] : memref<8x32xf32, #tpu.memory_space<vmem>>, vector<8x32xf32>
    %cst = arith.constant dense<0.000000e+00> : vector<8x8xf32>
    %2 = tpu.matmul %0, %1, %cst {dimension_numbers = #tpu.dot_dimension_numbers<[1], [1], [0], [0], [0, 0, 1, 0], [], []>} : vector<8x32xf32>, vector<8x32xf32>, vector<8x8xf32> -> vector<8x8xf32>
    %c0_3 = arith.constant 0 : index
    %c0_4 = arith.constant 0 : index
    %3 = vector.load %arg5[%c0_3, %c0_4] : memref<8x1xf32, #tpu.memory_space<vmem>>, vector<8x1xf32>
    %c0_5 = arith.constant 0 : index
    %c0_6 = arith.constant 0 : index
    %4 = vector.load %arg6[%c0_5, %c0_6] : memref<1x8xf32, #tpu.memory_space<vmem>>, vector<1x8xf32>
    %5 = vector.broadcast %3 : vector<8x1xf32> to vector<8x8xf32>
    %6 = vector.broadcast %4 : vector<1x8xf32> to vector<8x8xf32>
    %7 = arith.addf %5, %6 : vector<8x8xf32>
    %c0_7 = arith.constant 0 : index
    %c0_8 = arith.constant 0 : index
    %8 = memref.load %arg2[%c0_7, %c0_8] : memref<1x1xf32, #tpu.memory_space<smem>>
    %9 = vector.broadcast %8 : f32 to vector<8x8xf32>
    %10 = arith.mulf %9, %2 : vector<8x8xf32>
    %11 = arith.addf %7, %10 : vector<8x8xf32>
    %cst_9 = arith.constant 0.000000e+00 : f32
    %12 = vector.broadcast %cst_9 : f32 to vector<8x8xf32>
    %13 = arith.minimumf %11, %12 : vector<8x8xf32>
    %14 = math.exp %13 : vector<8x8xf32>
    %c0_10 = arith.constant 0 : index
    %c0_11 = arith.constant 0 : index
    %15 = vector.load %arg7[%c0_10, %c0_11] : memref<8x8xf32, #tpu.memory_space<vmem>>, vector<8x8xf32>
    tpu.vector_store %arg7[%c0_10, %c0_11], %14 {strides = array<i32>} : memref<8x8xf32, #tpu.memory_space<vmem>>, vector<8x8xf32>,
    return
  }
  func.func @transform_0(%arg0: i32, %arg1: i32) -> (i32, i32) {
    %c0_i32 = arith.constant 0 : i32
    %c0_i32_0 = arith.constant 0 : i32
    %c0_i32_1 = arith.constant 0 : i32
    return %c0_i32, %c0_i32_0 : i32, i32
  }
  func.func @transform_1(%arg0: i32, %arg1: i32) -> (i32, i32) {
    %c0_i32 = arith.constant 0 : i32
    %c0_i32_0 = arith.constant 0 : i32
    return %arg0, %c0_i32 : i32, i32
  }
  func.func @transform_2(%arg0: i32, %arg1: i32) -> (i32, i32) {
    %c0_i32 = arith.constant 0 : i32
    %c0_i32_0 = arith.constant 0 : i32
    return %arg1, %c0_i32 : i32, i32
  }
  func.func @transform_3(%arg0: i32, %arg1: i32) -> (i32, i32) {
    %c0_i32 = arith.constant 0 : i32
    %c0_i32_0 = arith.constant 0 : i32
    return %arg0, %c0_i32 : i32, i32
  }
  func.func @transform_4(%arg0: i32, %arg1: i32) -> (i32, i32) {
    %c0_i32 = arith.constant 0 : i32
    %c0_i32_0 = arith.constant 0 : i32
    return %c0_i32, %arg1 : i32, i32
  }
  func.func @transform_5(%arg0: i32, %arg1: i32) -> (i32, i32) {
    %c0_i32 = arith.constant 0 : i32
    return %arg0, %arg1 : i32, i32
  }
}

</mosaic_0001>

<bundles_post_ra>
// kernel: tpu_custom_call.1
= control target key start
LH: loop header
LB: loop body
LE: loop exit
PB: predicated region body
PF: predicated region fallthrough
CT: control target
= control target key end

     0   :  { %vm24_vm0 = vcmask 261120   ;;  %v179_v1 = vmov 0.0   ;;  %vm180_vm1 = vmmov 0   ;;  %s240_s0 = inlined_call_operand.<no memory space> [shape: f32[1,1], index: 0, kind: input, shape index: {}]   ;;  %s241_s1 = inlined_call_operand.vmem [shape: f32[8,32], index: 1, kind: input, shape index: {}]   ;;  %s242_s2 = inlined_call_operand.vmem [shape: f32[8,32], index: 2, kind: input, shape index: {}]   ;;  %s243_s3 = inlined_call_operand.vmem [shape: f32[8,1], index: 3, kind: input, shape index: {}]   ;;  %s244_s4 = inlined_call_operand.vmem [shape: f32[1,8], index: 4, kind: input, shape index: {}]   ;;  %s245_s5 = inlined_call_operand.hbm [shape: f32[8,8], index: 5, kind: output, shape index: {}]  }
   0x1   :  { %v23_v0 = vld [vmem:[%s242_s2] sm:$0xff]  ;;  %143 = vmatprep.subr.mxu0 %v179_v1  ;;  %145 = vmatprep.mubr.msk.f32.mxu0 %vm180_vm1, %v179_v1 }
   0x2   :  { %v101_v2 = vld [vmem:[%s243_s3] sm:$0xff] }
   0x3   :  { %11 = vsyncpa [#allocation4], 0  ;;  %144 = vmatpush3.xpose.msk.msra.mxu0 %vm24_vm0, %v23_v0  ;;  %v22_v3 = vld [vmem:[%s241_s1] sm:$0xff]  ;;  %v181_v4 = vmov 0   ;;  %v116_v7 = vstv %s240_s0  ;;  %s182_s1 = smov [#allocation3]   ;;  %vm122_vm2 = vcmask 64512  }
   0x4   :  { %152 = vset.pattern.permute.xlu0 %v181_v4  ;;  %v140_v5 = vld [vmem:[%s244_s4] ss:$0 sm:$0xff]  ;;  %s130_s3 = sshll.u32 %s182_s1, 4  ;;  %s131_s3 = int_to_ptr.vmem [resolvable:$true] %s130_s3 }
   0x5   :  { %105 = vperm.xlu0 %152, %v101_v2   ;;  %s155_s4 = scalar_lea.vmem %s131_s3, 128  ;;  %p160_p1 = scmp.lt.s32.totalorder %s131_s3, %s131_s3 }
   0x6   :  { %146 = vmatmul.mubr.msk.f32.vlgmr.msra.gmra.mrb[0].mxu0 %vm24_vm0, %v22_v3  ;;  %p156_p0 = scmp.ne.s32.totalorder %s131_s3, %s155_s4  ;;  %p161_p2 = scmp.lt.s32.totalorder %s155_s4, %s155_s4 }
   0x8   :  { %p162_p3 = por %p161_p2, %p160_p1 }
   0xa   :  { %p163_p4 = pnand %p162_p3, %p156_p0 }
  0x84   :  { %v106_v6 = vpop.permute.xlu0 %105 }
  0x85   :  { %v114_v8 = vadd.f32 %v140_v5, %v106_v6 }
  0xd9   :  { %v97_v9 = vpop.f32.mrb[0].mxu0 }
  0xda   :  { %v117_v10 = vmul.f32 %v116_v7, %v97_v9  ;;  %v147_v11 = vpop.f32.mrb[1].mxu0 }
  0xdc   :  { %v118_v12 = vadd.f32 %v117_v10, %v114_v8 }
  0xde   :  { %v119_v13 = vmin.f32 %v118_v12, 0.0 }
  0xe0   :  { %v120_v14 = vmul.f32 1.442695, %v119_v13 }
  0xe2   :  { %153 = vpow2.f32 %v120_v14 }
  0xec   :  { %v154_v15 = vpop.eup %153 }
  0xed   :  { %123 = vst.msk [vmem:[#allocation3] sm:$0xff] %vm122_vm2, %v154_v15 }
  0xee   :  { %166 = shalt.err (!%p163_p4)
}
  0xef   :  { %s167_s28 = scalar_lea.hbm %s245_s5, 128 }
  0xf0   :  { %p168_p5 = scmp.ne.s32.totalorder %s245_s5, %s167_s28  ;;  %p171_p6 = scmp.lt.u32.totalorder %s167_s28, %s245_s5 }
  0xf2   :  { %p173_p7 = pnand %p171_p6, %p168_p5 }
  0xf4   :  { %176 = shalt.err (!%p173_p7)
}
  0xf5   :  { %133 = dma.vmem_to_hbm [thread:$0]  %s131_s3, 128, %s245_s5, [#allocation4]  }
  0xf6   :  { %177 = dma.done.wait [#allocation4], 128  }
  0xf7   :  { %178 = vsyncadd [#allocation4], 4294967168 }
  0xf8   :  { %137 = vsyncpa [#allocation4], 1 }

</bundles_post_ra>
